<compile_context>
chip_gen: v7x
topology: tpu7x:2x2x1
jax: 0.10.0
libtpu: 0.0.40
codegen_flags: <defaults>
</compile_context>

<pallas_src>
import math

import jax
import jax.numpy as jnp
from jax.experimental import pallas as pl
from jax.experimental.pallas import tpu as pltpu


def _scale_kernel(scale_ref, x_ref, o_ref):
    # scale_ref: (1,) float32 scalar in SMEM (scalar prefetch).
    s = scale_ref[0]
    x = x_ref[...]
    if o_ref.dtype == x.dtype and o_ref.dtype != jnp.float32:
        # Non-promoting mode: native low-precision multiply (no f32 upcast,
        # half the HBM write traffic vs. storing f32).
        o_ref[...] = x * s.astype(o_ref.dtype)
    else:
        # PyTorch promotion semantics: compute in f32, store out_dtype.
        o_ref[...] = (x.astype(jnp.float32) * s).astype(o_ref.dtype)


def _round_up(a: int, b: int) -> int:
    return ((a + b - 1) // b) * b


def _round_down(a: int, b: int) -> int:
    return (a // b) * b


def _tpu_layout_params():
    """Returns (vmem_physical_bytes, multi_tensorcore) with safe fallbacks."""
    vmem_phys = None
    try:
        info = pltpu.get_tpu_info()
        cap = getattr(info, "vmem_capacity_bytes", None)
        if cap:
            vmem_phys = int(cap)
    except Exception:
        vmem_phys = None

    try:
        kind = jax.devices()[0].device_kind.lower()
    except Exception:
        kind = ""

    # v5e / v6e are single-TensorCore chips; v4 / v5p / v7x expose 2 TCs.
    single_tc = any(t in kind for t in ("v5e", "v5 lite", "v5litepod", "v6e", "v6 lite"))

    if vmem_phys is None:
        if single_tc:
            vmem_phys = 128 << 20          # v5e / v6e: 128 MiB VMEM
        elif ("v7" in kind) or ("7x" in kind):
            vmem_phys = 64 << 20           # v7x: 64 MiB per TC
        else:
            vmem_phys = 64 << 20           # unknown: be conservative
    return vmem_phys, (not single_tc)


def scale_forward(x: jax.Array, scale: jax.Array, *,
                  promote_to_float32: bool = True,
                  min_pallas_elements: int = 256 * 1024) -> jax.Array:
    """out = x * scale  (scale is a (1,)-shaped f32 parameter, like nn.Parameter)."""
    orig_shape = x.shape
    total = int(math.prod(orig_shape)) if orig_shape else 1

    # Keep the learnable scalar in float32 (nn.Parameter(FloatTensor([v]))).
    scale = scale.astype(jnp.float32).reshape((1,))
    if promote_to_float32 or not jnp.issubdtype(x.dtype, jnp.floating):
        out_dtype = jnp.result_type(x.dtype, jnp.float32)
    else:
        out_dtype = x.dtype

    # Tiny / empty tensors: a fused scalar multiply in plain JAX beats the
    # pallas_call launch and wrapper reshapes.
    if total == 0 or total < min_pallas_elements:
        return (x * scale[0]).astype(out_dtype).reshape(orig_shape)

    in_itemsize = jnp.dtype(x.dtype).itemsize
    out_itemsize = jnp.dtype(out_dtype).itemsize

    # Lane-dense flattened 2-D view: largest cols (multiple of 128) dividing
    # `total` so the common path needs no padding / slicing pass at all.
    cols = 128
    for c in (1024, 512, 256, 128):
        if total % c == 0:
            cols = c
            break

    flat = x.reshape(-1)
    padded_total = _round_up(total, cols)
    if padded_total != total:
        # Ragged total: pad only the sub-row tail (< cols elements).
        flat = jnp.pad(flat, (0, padded_total - total))
    rows = padded_total // cols
    x2 = flat.reshape(rows, cols)

    vmem_phys, multi_tc = _tpu_layout_params()
    # Scoped-VMEM budget: half of physical, capped at 64 MiB, minus headroom
    # for compiler-internal scratch.
    vmem_budget = min(vmem_phys // 2, 64 << 20)
    per_buffer = max(1 << 20, (vmem_budget - (4 << 20)) // 2)  # in+out of ONE block
    bytes_per_row = cols * (in_itemsize + out_itemsize)
    max_tile_r_budget = max(8, _round_down(per_buffer // bytes_per_row, 8))

    # Enough grid steps to keep the DMA pipeline full (and, on multi-TC chips,
    # both TensorCores busy), but never shrink blocks below ~1 MiB of input.
    min_steps = 8 if multi_tc else 4
    min_tile_r = max(8, _round_down((1 << 20) // (cols * in_itemsize), 8))
    desired_tile_r = _round_up(pl.cdiv(rows, min_steps), 8)
    tile_r = max(min_tile_r, desired_tile_r)
    tile_r = min(tile_r, max_tile_r_budget)
    if tile_r >= rows:
        tile_r = rows  # single full-extent block along rows (always valid)

    grid = (pl.cdiv(rows, tile_r),)  # ragged last block masked by Pallas

    block_in = tile_r * cols * in_itemsize
    block_out = tile_r * cols * out_itemsize
    vmem_limit = int(min(max(2 * (block_in + block_out) + (2 << 20), 32 << 20),
                         vmem_budget))

    out2 = pl.pallas_call(
        _scale_kernel,
        out_shape=jax.ShapeDtypeStruct((rows, cols), out_dtype),
        grid_spec=pltpu.PrefetchScalarGridSpec(
            num_scalar_prefetch=1,  # scale -> SMEM once, before the grid runs
            grid=grid,
            in_specs=[pl.BlockSpec((tile_r, cols), lambda i, s: (i, 0))],
            out_specs=pl.BlockSpec((tile_r, cols), lambda i, s: (i, 0)),
        ),
        compiler_params=pltpu.CompilerParams(
            dimension_semantics=("parallel",),
            vmem_limit_bytes=vmem_limit,
        ),
    )(scale, x2)

    out_flat = out2.reshape(-1)
    if padded_total != total:
        out_flat = out_flat[:total]
    return out_flat.reshape(orig_shape)


class ScalePallas:
    """JAX/Pallas equivalent of the PyTorch Scale module."""

    def __init__(self, init_value: float = 1.0):
        # nn.Parameter(torch.FloatTensor([init_value])) -> shape (1,), float32
        self.scale = jnp.array([init_value], dtype=jnp.float32)

    def __call__(self, x: jax.Array) -> jax.Array:
        return scale_forward(x, self.scale)


if __name__ == "__main__":
    key = jax.random.PRNGKey(0)
    # NCHW input, small shapes: batch=2, channels=4, spatial=16x16
    x = jax.random.normal(key, (2, 4, 16, 16), dtype=jnp.float32)

    module = ScalePallas(init_value=1.5)
    # Force the Pallas path even at this small demo size.
    out = jax.block_until_ready(
        scale_forward(x, module.scale, min_pallas_elements=0))

    ref = x * module.scale
    assert out.shape == x.shape
    assert out.dtype == x.dtype
    assert jnp.allclose(out, ref, atol=1e-6, rtol=1e-6)

    # Ragged-size sanity check (exercises the < cols tail-pad path).
    x2 = jax.random.normal(jax.random.PRNGKey(1), (3, 5, 7), dtype=jnp.float32)
    out2 = jax.block_until_ready(
        scale_forward(x2, module.scale, min_pallas_elements=0))
    assert out2.shape == x2.shape
    assert jnp.allclose(out2, x2 * module.scale, atol=1e-6, rtol=1e-6)

    print("KERNEL_OK")
</pallas_src>

<mosaic_0001>
module attributes {stable_mosaic.version = 11 : i64} {
  func.func @_scale_kernel(%arg0: i32, %arg1: memref<1xf32, #tpu.memory_space<smem>>, %arg2: memref<2x1024xf32, #tpu.memory_space<vmem>>, %arg3: memref<2x1024xf32, #tpu.memory_space<vmem>>) attributes {dimension_semantics = [#tpu.dimension_semantics<parallel>], iteration_bounds = array<i64: 1>, scalar_prefetch = 1 : i64, scratch_operands = 0 : i64, tpu.core_type = #tpu.core_type<tc>, window_params = [{transform_indices = @transform_0, window_bounds = array<i64: 2, 1024>}, {transform_indices = @transform_1, window_bounds = array<i64: 2, 1024>}]} {
    %c0 = arith.constant 0 : index
    %0 = memref.load %arg1[%c0] : memref<1xf32, #tpu.memory_space<smem>>
    %c0_0 = arith.constant 0 : index
    %c0_1 = arith.constant 0 : index
    %1 = vector.load %arg2[%c0_0, %c0_1] : memref<2x1024xf32, #tpu.memory_space<vmem>>, vector<2x1024xf32>
    %2 = vector.broadcast %0 : f32 to vector<2x1024xf32>
    %3 = arith.mulf %1, %2 : vector<2x1024xf32>
    %c0_2 = arith.constant 0 : index
    %c0_3 = arith.constant 0 : index
    %4 = vector.load %arg3[%c0_2, %c0_3] : memref<2x1024xf32, #tpu.memory_space<vmem>>, vector<2x1024xf32>
    tpu.vector_store %arg3[%c0_2, %c0_3], %3 {strides = array<i32>} : memref<2x1024xf32, #tpu.memory_space<vmem>>, vector<2x1024xf32>,
    return
  }
  func.func @transform_0(%arg0: i32, %arg1: memref<1xf32, #tpu.memory_space<smem>>) -> (i32, i32) {
    %c0_i32 = arith.constant 0 : i32
    %c0_i32_0 = arith.constant 0 : i32
    return %arg0, %c0_i32 : i32, i32
  }
  func.func @transform_1(%arg0: i32, %arg1: memref<1xf32, #tpu.memory_space<smem>>) -> (i32, i32) {
    %c0_i32 = arith.constant 0 : i32
    %c0_i32_0 = arith.constant 0 : i32
    return %arg0, %c0_i32 : i32, i32
  }
}

</mosaic_0001>

<bundles_post_ra>
// kernel: tpu_custom_call.1
= control target key start
LH: loop header
LB: loop body
LE: loop exit
PB: predicated region body
PF: predicated region fallthrough
CT: control target
= control target key end

     0   :  { %8 = vsyncpa [#allocation5], 0  ;;  %s140_s0 = inlined_call_operand.<no memory space> [shape: f32[1], index: 0, kind: input, shape index: {}]   ;;  %s141_s1 = inlined_call_operand.hbm [shape: f32[2,1024], index: 1, kind: input, shape index: {}]   ;;  %s142_s2 = inlined_call_operand.hbm [shape: f32[2,1024], index: 2, kind: output, shape index: {}]  }
   0x1   :  { %9 = vsyncpa [#allocation6], 0  ;;  %s96_s9 = smov [#allocation4]   ;;  %s48_s13 = scalar_lea.hbm %s141_s1, 256 }
   0x2   :  { %s16_s10 = sshll.u32 %s96_s9, 4  ;;  %p49_p0 = scmp.ne.s32.totalorder %s141_s1, %s48_s13  ;;  %s17_s10 = int_to_ptr.vmem [resolvable:$true] %s16_s10 }
   0x3   :  { %p52_p1 = scmp.lt.u32.totalorder %s48_s13, %s141_s1 }
   0x5   :  { %p54_p2 = pnand %p52_p1, %p49_p0 }
   0x7   :  { %57 = shalt.err (!%p54_p2)
}
   0x8   :  { %s58_s18 = scalar_lea.vmem %s17_s10, 256  ;;  %p63_p4 = scmp.lt.s32.totalorder %s17_s10, %s17_s10 }
   0x9   :  { %p59_p3 = scmp.ne.s32.totalorder %s17_s10, %s58_s18  ;;  %p64_p5 = scmp.lt.s32.totalorder %s58_s18, %s58_s18 }
   0xb   :  { %p65_p6 = por %p64_p5, %p63_p4 }
   0xd   :  { %p66_p7 = pnand %p65_p6, %p59_p3 }
   0xf   :  { %69 = shalt.err (!%p66_p7)
}
  0x10   :  { %19 = dma.hbm_to_vmem [thread:$0]  %s141_s1, 256, %s17_s10, [#allocation5]  }
  0x11   :  { %92 = dma.done.wait [#allocation5], 256  }
  0x12   :  { %93 = vsyncadd [#allocation5], 4294967040  ;;  %v26_v0 = vstv %s140_s0  ;;  %s97_s23 = smov [#allocation7]   ;;  %v24_v1 = vld [vmem:[#allocation4] sm:$0xff]  ;;  %v25_v2 = vld [vmem:[#allocation4 + $0x8] sm:$0xff] }
  0x13   :  { %s37_s24 = sshll.u32 %s97_s23, 4  ;;  %v27_v3 = vmul.f32 %v26_v0, %v24_v1  ;;  %v28_v4 = vmul.f32 %v26_v0, %v25_v2  ;;  %s38_s24 = int_to_ptr.vmem [resolvable:$true] %s37_s24 }
  0x14   :  { %s70_s25 = scalar_lea.vmem %s38_s24, 256  ;;  %p75_p9 = scmp.lt.s32.totalorder %s38_s24, %s38_s24 }
  0x15   :  { %29 = vst [vmem:[#allocation7] sm:$0xff] %v27_v3  ;;  %30 = vst [vmem:[#allocation7 + $0x8] sm:$0xff] %v28_v4  ;;  %p71_p8 = scmp.ne.s32.totalorder %s38_s24, %s70_s25  ;;  %p76_p10 = scmp.lt.s32.totalorder %s70_s25, %s70_s25 }
  0x17   :  { %p77_p11 = por %p76_p10, %p75_p9 }
  0x19   :  { %p78_p12 = pnand %p77_p11, %p71_p8 }
  0x1b   :  { %81 = shalt.err (!%p78_p12)
}
  0x1c   :  { %s82_s0 = scalar_lea.hbm %s142_s2, 256 }
  0x1d   :  { %p83_p13 = scmp.ne.s32.totalorder %s142_s2, %s82_s0  ;;  %p86_p0 = scmp.lt.u32.totalorder %s82_s0, %s142_s2 }
  0x1f   :  { %p88_p1 = pnand %p86_p0, %p83_p13 }
  0x21   :  { %91 = shalt.err (!%p88_p1)
}
  0x22   :  { %40 = dma.vmem_to_hbm [thread:$0]  %s38_s24, 256, %s142_s2, [#allocation6]  }
  0x23   :  { %94 = dma.done.wait [#allocation6], 256  }
  0x24   :  { %95 = vsyncadd [#allocation6], 4294967040 }
  0x25   :  { %44 = vsyncpa [#allocation5], 1 }
  0x26   :  { %45 = vsyncpa [#allocation6], 1 }

</bundles_post_ra>
